<compile_context>
chip_gen: v7x
topology: tpu7x:2x2x1
jax: 0.10.0
libtpu: 0.0.40
codegen_flags: <defaults>
</compile_context>

<pallas_src>
import functools

import numpy as np
import jax
import jax.numpy as jnp
from jax import lax
from jax.experimental import pallas as pl
from jax.experimental.pallas import tpu as pltpu

_LANES = 128
# Double-buffered block-buffer budget per pallas_call (leaves ~16 MiB headroom for
# Mosaic temporaries under the 32 MiB scoped-VMEM limit set below).
_BLOCK_BYTES_BUDGET = 16 * 1024 * 1024
_VMEM_LIMIT_BYTES = 32 * 1024 * 1024      # safe on v5e/v6e (128 MiB) and v7x (64 MiB)

_MANT_MASK = 0x007FFFFF                   # 23 mantissa bits
_ONE_BITS = 0x3F800000                    # float32 1.0
_GOLD = int(np.uint32(0x9E3779B9).view(np.int32))   # golden-ratio mixer (as int32)


@functools.lru_cache(maxsize=None)
def _on_tpu():
    return jax.default_backend() == "tpu"


def _cparams():
    if _on_tpu():
        # Row-tile axis is embarrassingly parallel (v7x shards it across its 2 TCs);
        # explicit vmem_limit_bytes also raises v5e's 16 MiB default scoped limit.
        return pltpu.CompilerParams(dimension_semantics=("parallel",),
                                    vmem_limit_bytes=_VMEM_LIMIT_BYTES)
    return None


# ----------------------------- noise helpers -------------------------------- #

def _bits_to_pm_half(bits):
    """Map 32 random bits -> uniform float32 in [-0.5, 0.5).

    Exponent trick: 23 random mantissa bits | 1.0f -> [1.0, 2.0) -> subtract 1.5.
    """
    fbits = jnp.bitwise_or(jnp.bitwise_and(bits, _MANT_MASK), _ONE_BITS)
    return lax.bitcast_convert_type(fbits.astype(jnp.int32), jnp.float32) - jnp.float32(1.5)


def _hw_uniform_pm_half(shape, seed):
    """Hardware PRNG noise: a handful of VPU ops per vreg (mem-bound on all chips)."""
    # Per-block distinct seed so tiles never share a stream.
    pltpu.prng_seed(seed * _GOLD + pl.program_id(0))
    return _bits_to_pm_half(pltpu.prng_random_bits(shape))


def _hash_uniform_pm_half(shape, seed, block_index, block_elems):
    """Portable counter-based fallback (murmur-style); only used off-TPU (interpret
    mode / CPU), where performance is irrelevant."""
    row = lax.broadcasted_iota(jnp.int32, shape, 0)
    col = lax.broadcasted_iota(jnp.int32, shape, 1)
    ctr = (block_index * block_elems + row * shape[1] + col).astype(jnp.uint32)
    h = ctr + seed.astype(jnp.uint32) * jnp.uint32(0x9E3779B9)
    for _ in range(2):
        h = (h ^ (h >> 16)) * jnp.uint32(0x85EBCA6B)
        h = (h ^ (h >> 13)) * jnp.uint32(0xC2B2AE35)
        h = (h ^ (h >> 16)) + seed.astype(jnp.uint32)
    return _bits_to_pm_half(h)


# ----------------------------- kernels -------------------------------------- #

def _process_kernel(seed_ref, x_ref, out_ref, *, quantize, perturb, use_hw_prng,
                    block_elems):
    x = x_ref[...].astype(jnp.float32)
    if quantize:
        x = jnp.round(x)                 # round-half-to-even, same as torch.round
    if perturb:
        if use_hw_prng:
            noise = _hw_uniform_pm_half(x.shape, seed_ref[0])
        else:
            noise = _hash_uniform_pm_half(x.shape, seed_ref[0], pl.program_id(0),
                                          block_elems)
        x = x + noise
    out_ref[...] = x.astype(out_ref.dtype)


def _quantize_kernel(off_ref, x_ref, q_ref, xr_ref, *, clamp):
    off = off_ref[0]
    r = jnp.round(x_ref[...].astype(jnp.float32) - off)
    xr_ref[...] = (r + off).astype(xr_ref.dtype)          # restored tensor, unclamped
    if clamp is not None:                                  # only for int8/int16 symbols
        r = jnp.clip(r, clamp[0], clamp[1])
    q_ref[...] = r.astype(q_ref.dtype)


def _dequantize_kernel(off_ref, x_ref, out_ref):
    out_ref[...] = x_ref[...].astype(jnp.float32) + off_ref[0]


# ----------------------------- tiling glue ----------------------------------- #

def _to_lanes(x):
    """Flatten to a lane-dense (rows, 128) slab.

    Padding (an extra HBM pass) only triggers when numel % 128 != 0; ragged row
    counts are handled by Pallas' partial final block, not by padding.
    """
    n = x.size
    flat = x.reshape(-1)
    pad = (-n) % _LANES
    if pad:
        # TODO(synk): a <128-element tail could be handled by a tiny side kernel to
        # avoid this whole-tensor pad/slice round trip; not worth it for now.
        flat = jnp.pad(flat, (0, pad))
    return flat.reshape(-1, _LANES), n


def _from_lanes(y2d, n, shape):
    flat = y2d.reshape(-1)
    if flat.shape[0] != n:
        flat = flat[:n]
    return flat.reshape(shape)


def _tiling(rows, row_bytes):
    """Pick tile rows so double-buffered block buffers stay ~<= _BLOCK_BYTES_BUDGET.

    row_bytes = 128 * sum(itemsize over all tiled inputs + outputs).
    """
    tile_rows = _BLOCK_BYTES_BUDGET // (2 * row_bytes)     # 2 = double buffering
    tile_rows = max((tile_rows // 8) * 8, 8)               # keep (8,128) alignment
    if rows <= tile_rows:
        tile_rows = rows                                   # single full-array block
    return (pl.cdiv(rows, tile_rows),), tile_rows


def _tile_spec(tile_rows):
    return pl.BlockSpec((tile_rows, _LANES), lambda i: (i, 0))


def _smem_spec():
    # Scalars (seed / offset) ride in SMEM.  PrefetchScalarGridSpec would be
    # equivalent here; the scalar is never needed inside an index_map.
    return pl.BlockSpec(memory_space=pltpu.MemorySpace.SMEM)


# ----------------------------- process (STE) --------------------------------- #

def _run_process(x, seed, quantize, perturb, use_hw_prng):
    x2d, n = _to_lanes(x)
    row_bytes = _LANES * (x2d.dtype.itemsize * 2)          # input slab + output slab
    grid, tile_rows = _tiling(x2d.shape[0], row_bytes)
    kernel = functools.partial(_process_kernel, quantize=quantize, perturb=perturb,
                               use_hw_prng=use_hw_prng,
                               block_elems=tile_rows * _LANES)
    y2d = pl.pallas_call(
        kernel,
        out_shape=jax.ShapeDtypeStruct(x2d.shape, x2d.dtype),
        grid=grid,
        in_specs=[_smem_spec(), _tile_spec(tile_rows)],
        out_specs=_tile_spec(tile_rows),
        compiler_params=_cparams(),
    )(seed, x2d)
    return _from_lanes(y2d, n, x.shape)


# Straight-through estimator as a custom_vjp: forward value is EXACTLY the kernel
# output (round(x) and/or x + U(-0.5,0.5)); backward is identity w.r.t. x.  This
# replaces the previous `x + stop_gradient(y - x)` wrapper, which cost an extra
# full-tensor XLA fusion (~1.5x additional HBM traffic) on every call.
@functools.partial(jax.custom_vjp, nondiff_argnums=(2, 3, 4))
def _process_ste(x, seed, quantize, perturb, use_hw_prng):
    return _run_process(x, seed, quantize, perturb, use_hw_prng)


def _process_ste_fwd(x, seed, quantize, perturb, use_hw_prng):
    return _run_process(x, seed, quantize, perturb, use_hw_prng), None


def _process_ste_bwd(quantize, perturb, use_hw_prng, _, g):
    # d/dx = identity; seed is integer-valued -> float0 cotangent.
    return g, np.zeros((1,), dtype=jax.dtypes.float0)


_process_ste.defvjp(_process_ste_fwd, _process_ste_bwd)


@functools.partial(jax.jit, static_argnames=("quantize", "perturb", "use_hw_prng"))
def _process_impl(x, seed, *, quantize, perturb, use_hw_prng):
    if not (quantize or perturb):
        return x
    seed = jnp.asarray(seed, jnp.int32).reshape(1)
    return _process_ste(x, seed, quantize, perturb, use_hw_prng)


# ----------------------------- quantize / dequantize ------------------------- #

@functools.partial(jax.jit, static_argnames=("symbol_dtype",))
def _quantize_impl(x, offset, *, symbol_dtype):
    sym_dtype = jnp.dtype(symbol_dtype)
    clamp = None
    if jnp.issubdtype(sym_dtype, jnp.integer) and sym_dtype.itemsize < 4:
        info = jnp.iinfo(sym_dtype)                         # defined narrowing cast
        clamp = (float(info.min), float(info.max))
    x2d, n = _to_lanes(x)
    row_bytes = _LANES * (x2d.dtype.itemsize * 2 + sym_dtype.itemsize)
    grid, tile_rows = _tiling(x2d.shape[0], row_bytes)
    q2d, xr2d = pl.pallas_call(
        functools.partial(_quantize_kernel, clamp=clamp),
        out_shape=(jax.ShapeDtypeStruct(x2d.shape, sym_dtype),
                   jax.ShapeDtypeStruct(x2d.shape, x2d.dtype)),
        grid=grid,
        in_specs=[_smem_spec(), _tile_spec(tile_rows)],
        out_specs=(_tile_spec(tile_rows), _tile_spec(tile_rows)),
        compiler_params=_cparams(),
    )(jnp.asarray(offset, jnp.float32).reshape(1), x2d)
    return _from_lanes(q2d, n, x.shape), _from_lanes(xr2d, n, x.shape)


@jax.jit
def _dequantize_impl(x, offset):
    x2d, n = _to_lanes(x)                                   # native int dtype in
    row_bytes = _LANES * (x2d.dtype.itemsize + 4)
    grid, tile_rows = _tiling(x2d.shape[0], row_bytes)
    y2d = pl.pallas_call(
        _dequantize_kernel,
        out_shape=jax.ShapeDtypeStruct(x2d.shape, jnp.float32),
        grid=grid,
        in_specs=[_smem_spec(), _tile_spec(tile_rows)],
        out_specs=_tile_spec(tile_rows),
        compiler_params=_cparams(),
    )(jnp.asarray(offset, jnp.float32).reshape(1), x2d)
    return _from_lanes(y2d, n, x.shape)


# ----------------------------- module ---------------------------------------- #

class ContinuousEntropyModelBase:
    """JAX/Pallas port of the PyTorch ContinuousEntropyModelBase numeric paths."""

    def __init__(self, coding_ndim, bottleneck_process, bottleneck_scaler,
                 lower_bound, upper_bound, batch_shape, overflow_coding, prior=None):
        self.quantize_bottleneck = 'quantization' in bottleneck_process
        if self.quantize_bottleneck:
            bottleneck_process = bottleneck_process.replace('quantization', '', 1)
        self.perturb_bottleneck = 'noise' in bottleneck_process
        if self.perturb_bottleneck:
            bottleneck_process = bottleneck_process.replace('noise', '', 1)
        assert bottleneck_process in (',', '_', ' ', '+', ''), \
            f'Unexpected bottleneck_process: {bottleneck_process}'
        self.coding_ndim = coding_ndim
        self.bottleneck_scaler = bottleneck_scaler
        self.lower_bound = jnp.asarray(lower_bound, jnp.int32)
        self.upper_bound = jnp.asarray(upper_bound, jnp.int32)
        self.batch_shape = tuple(batch_shape)
        self.overflow_coding = overflow_coding
        self.prior = prior
        # TODO(synk): DistributionQuantizedCDFTable.build_quantized_cdf_table /
        # IndexedRansCoder are host-side range-coder bookkeeping (CPU lists of
        # quantized CDFs) with no Pallas equivalent; not implemented here.

    # -- training hot path: straight-through quantize and/or uniform noise --
    def process(self, x, seed=0):
        return _process_impl(x, seed, quantize=self.quantize_bottleneck,
                             perturb=self.perturb_bottleneck,
                             use_hw_prng=_on_tpu())

    def perturb(self, x, seed=0):
        return _process_impl(x, seed, quantize=False, perturb=True,
                             use_hw_prng=_on_tpu())

    # -- quantize: returns (int symbols, restored tensor). symbol_dtype=int32 matches
    #    torch; pass jnp.int8/int16 (clamped in-kernel to the dtype range) to cut
    #    symbol writeback bandwidth when bounds are small (biggest win on v5e).
    def quantize(self, x, offset=0.0, symbol_dtype=jnp.int32):
        return _quantize_impl(x, offset, symbol_dtype=jnp.dtype(symbol_dtype))

    # -- dequantize: integer symbols (any int dtype) -> float32, offset added in-kernel --
    def dequantize(self, x, offset=0.0):
        return _dequantize_impl(x, offset)

    def forward(self, *args, **kwargs):
        raise NotImplementedError  # same as the PyTorch base class

    def compress(self, *args, **kwargs):
        raise NotImplementedError

    def decompress(self, *args, **kwargs):
        raise NotImplementedError


# ----------------------------- demo / self-test ------------------------------ #

if __name__ == "__main__":
    key = jax.random.PRNGKey(0)
    # NCHW input, small shapes: batch=2, channels=4, spatial=16x16
    x = jax.random.normal(key, (2, 4, 16, 16), jnp.float32) * 3.0

    model_noise = ContinuousEntropyModelBase(
        coding_ndim=2, bottleneck_process='noise', bottleneck_scaler=1,
        lower_bound=-8, upper_bound=8, batch_shape=(4,), overflow_coding=True)
    model_quant = ContinuousEntropyModelBase(
        coding_ndim=2, bottleneck_process='quantization,noise', bottleneck_scaler=1,
        lower_bound=-8, upper_bound=8, batch_shape=(4,), overflow_coding=True)
    model_q_only = ContinuousEntropyModelBase(
        coding_ndim=2, bottleneck_process='quantization', bottleneck_scaler=1,
        lower_bound=-8, upper_bound=8, batch_shape=(4,), overflow_coding=True)

    y_noise = model_noise.process(x, seed=7)          # x + U(-0.5, 0.5)
    y_both = model_quant.process(x, seed=7)           # round(x) + U(-0.5, 0.5)
    y_round = model_q_only.process(x)                 # round(x), identity gradient
    q, x_restored = model_noise.quantize(x, offset=0.25)
    deq = model_noise.dequantize(q, offset=0.25)
    # straight-through gradient check: d(process)/dx must be identity
    grad = jax.grad(lambda t: model_quant.process(t, seed=7).sum())(x)

    # larger aligned tensor: exercises the multi-block grid + big-tile VMEM budget
    x_big = jax.random.normal(jax.random.PRNGKey(1), (2, 8, 256, 512), jnp.float32) * 2.0
    y_big = model_noise.process(x_big, seed=3)
    q_big, xr_big = model_noise.quantize(x_big, offset=0.0)

    # ragged tensor (numel % 128 != 0): exercises the pad path
    x_rag = jax.random.normal(jax.random.PRNGKey(2), (3, 5, 7, 11), jnp.float32) * 3.0
    y_rag = model_q_only.process(x_rag)
    q_rag, xr_rag = model_noise.quantize(x_rag, offset=0.5)

    jax.block_until_ready((y_noise, y_both, y_round, q, x_restored, deq, grad,
                           y_big, q_big, xr_big, y_rag, q_rag, xr_rag))

    # correctness checks against pure-JAX reference semantics
    assert y_noise.shape == x.shape and y_noise.dtype == jnp.float32
    assert jnp.all(jnp.abs(y_noise - x) <= 0.5 + 1e-4)
    assert float(jnp.std(y_noise - x)) > 0.1          # noise is actually present
    assert jnp.allclose(y_round, jnp.round(x))
    assert jnp.all(jnp.abs(y_both - jnp.round(x)) <= 0.5 + 1e-4)
    assert q.dtype == jnp.int32
    assert jnp.array_equal(q, jnp.round(x - 0.25).astype(jnp.int32))
    assert jnp.allclose(x_restored, jnp.round(x - 0.25) + 0.25)
    assert jnp.allclose(deq, q.astype(jnp.float32) + 0.25)
    assert jnp.allclose(grad, 1.0)                    # STE: identity gradient

    assert jnp.all(jnp.abs(y_big - x_big) <= 0.5 + 1e-4)
    assert float(jnp.std(y_big - x_big)) > 0.1
    assert jnp.array_equal(q_big, jnp.round(x_big).astype(jnp.int32))
    assert jnp.allclose(xr_big, jnp.round(x_big))

    assert jnp.allclose(y_rag, jnp.round(x_rag))
    assert jnp.array_equal(q_rag, jnp.round(x_rag - 0.5).astype(jnp.int32))
    assert jnp.allclose(xr_rag, jnp.round(x_rag - 0.5) + 0.5)

    print("KERNEL_OK")
</pallas_src>

<mosaic_0001>
module attributes {stable_mosaic.version = 11 : i64} {
  func.func @_process_kernel(%arg0: i32, %arg1: memref<1xi32, #tpu.memory_space<smem>>, %arg2: memref<16x128xf32, #tpu.memory_space<vmem>>, %arg3: memref<16x128xf32, #tpu.memory_space<vmem>>) attributes {dimension_semantics = [#tpu.dimension_semantics<arbitrary>], iteration_bounds = array<i64: 1>, scalar_prefetch = 0 : i64, scratch_operands = 0 : i64, tpu.core_type = #tpu.core_type<tc>, window_params = [{transform_indices = @transform_0, window_bounds = array<i64: 1>}, {transform_indices = @transform_1, window_bounds = array<i64: 16, 128>}, {transform_indices = @transform_2, window_bounds = array<i64: 16, 128>}]} {
    %c0 = arith.constant 0 : index
    %c0_0 = arith.constant 0 : index
    %0 = vector.load %arg2[%c0, %c0_0] : memref<16x128xf32, #tpu.memory_space<vmem>>, vector<16x128xf32>
    %c0_1 = arith.constant 0 : index
    %1 = memref.load %arg1[%c0_1] : memref<1xi32, #tpu.memory_space<smem>>
    %2 = tpu.iota {dimensions = array<i32: 0>} : vector<16x128xi32>
    %3 = tpu.iota {dimensions = array<i32: 1>} : vector<16x128xi32>
    %c2048_i32 = arith.constant 2048 : i32
    %4 = arith.muli %arg0, %c2048_i32 : i32
    %c128_i32 = arith.constant 128 : i32
    %5 = vector.broadcast %c128_i32 : i32 to vector<16x128xi32>
    %6 = arith.muli %2, %5 : vector<16x128xi32>
    %7 = vector.broadcast %4 : i32 to vector<16x128xi32>
    %8 = arith.addi %7, %6 : vector<16x128xi32>
    %9 = arith.addi %8, %3 : vector<16x128xi32>
    %c-1640531527_i32 = arith.constant -1640531527 : i32
    %10 = arith.muli %1, %c-1640531527_i32 : i32
    %11 = vector.broadcast %10 : i32 to vector<16x128xi32>
    %12 = arith.addi %9, %11 : vector<16x128xi32>
    %c16_i32 = arith.constant 16 : i32
    %13 = vector.broadcast %c16_i32 : i32 to vector<16x128xi32>
    %14 = arith.shrui %12, %13 : vector<16x128xi32>
    %15 = arith.xori %12, %14 : vector<16x128xi32>
    %c-2048144789_i32 = arith.constant -2048144789 : i32
    %16 = vector.broadcast %c-2048144789_i32 : i32 to vector<16x128xi32>
    %17 = arith.muli %15, %16 : vector<16x128xi32>
    %c13_i32 = arith.constant 13 : i32
    %18 = vector.broadcast %c13_i32 : i32 to vector<16x128xi32>
    %19 = arith.shrui %17, %18 : vector<16x128xi32>
    %20 = arith.xori %17, %19 : vector<16x128xi32>
    %c-1028477387_i32 = arith.constant -1028477387 : i32
    %21 = vector.broadcast %c-1028477387_i32 : i32 to vector<16x128xi32>
    %22 = arith.muli %20, %21 : vector<16x128xi32>
    %c16_i32_2 = arith.constant 16 : i32
    %23 = vector.broadcast %c16_i32_2 : i32 to vector<16x128xi32>
    %24 = arith.shrui %22, %23 : vector<16x128xi32>
    %25 = arith.xori %22, %24 : vector<16x128xi32>
    %26 = vector.broadcast %1 : i32 to vector<16x128xi32>
    %27 = arith.addi %25, %26 : vector<16x128xi32>
    %c16_i32_3 = arith.constant 16 : i32
    %28 = vector.broadcast %c16_i32_3 : i32 to vector<16x128xi32>
    %29 = arith.shrui %27, %28 : vector<16x128xi32>
    %30 = arith.xori %27, %29 : vector<16x128xi32>
    %c-2048144789_i32_4 = arith.constant -2048144789 : i32
    %31 = vector.broadcast %c-2048144789_i32_4 : i32 to vector<16x128xi32>
    %32 = arith.muli %30, %31 : vector<16x128xi32>
    %c13_i32_5 = arith.constant 13 : i32
    %33 = vector.broadcast %c13_i32_5 : i32 to vector<16x128xi32>
    %34 = arith.shrui %32, %33 : vector<16x128xi32>
    %35 = arith.xori %32, %34 : vector<16x128xi32>
    %c-1028477387_i32_6 = arith.constant -1028477387 : i32
    %36 = vector.broadcast %c-1028477387_i32_6 : i32 to vector<16x128xi32>
    %37 = arith.muli %35, %36 : vector<16x128xi32>
    %c16_i32_7 = arith.constant 16 : i32
    %38 = vector.broadcast %c16_i32_7 : i32 to vector<16x128xi32>
    %39 = arith.shrui %37, %38 : vector<16x128xi32>
    %40 = arith.xori %37, %39 : vector<16x128xi32>
    %41 = vector.broadcast %1 : i32 to vector<16x128xi32>
    %42 = arith.addi %40, %41 : vector<16x128xi32>
    %c8388607_i32 = arith.constant 8388607 : i32
    %43 = vector.broadcast %c8388607_i32 : i32 to vector<16x128xi32>
    %44 = arith.andi %42, %43 : vector<16x128xi32>
    %c1065353216_i32 = arith.constant 1065353216 : i32
    %45 = vector.broadcast %c1065353216_i32 : i32 to vector<16x128xi32>
    %46 = arith.ori %44, %45 : vector<16x128xi32>
    %47 = tpu.bitcast %46 : vector<16x128xi32> -> vector<16x128xf32>
    %cst = arith.constant 1.500000e+00 : f32
    %48 = vector.broadcast %cst : f32 to vector<16x128xf32>
    %49 = arith.subf %47, %48 : vector<16x128xf32>
    %50 = arith.addf %0, %49 : vector<16x128xf32>
    %c0_8 = arith.constant 0 : index
    %c0_9 = arith.constant 0 : index
    %51 = vector.load %arg3[%c0_8, %c0_9] : memref<16x128xf32, #tpu.memory_space<vmem>>, vector<16x128xf32>
    tpu.vector_store %arg3[%c0_8, %c0_9], %50 {strides = array<i32>} : memref<16x128xf32, #tpu.memory_space<vmem>>, vector<16x128xf32>,
    return
  }
  func.func @transform_0(%arg0: i32) -> i32 {
    %c0_i32 = arith.constant 0 : i32
    %c0_i32_0 = arith.constant 0 : i32
    return %c0_i32 : i32
  }
  func.func @transform_1(%arg0: i32) -> (i32, i32) {
    %c0_i32 = arith.constant 0 : i32
    %c0_i32_0 = arith.constant 0 : i32
    return %arg0, %c0_i32 : i32, i32
  }
  func.func @transform_2(%arg0: i32) -> (i32, i32) {
    %c0_i32 = arith.constant 0 : i32
    %c0_i32_0 = arith.constant 0 : i32
    return %arg0, %c0_i32 : i32, i32
  }
}

</mosaic_0001>

<bundles_post_ra>
// kernel: _process_impl.1
= control target key start
LH: loop header
LB: loop body
LE: loop exit
PB: predicated region body
PF: predicated region fallthrough
CT: control target
= control target key end

     0   :  { %v15_v0 = vlaneseq  ;;  %s120_s0 = inlined_call_operand.<no memory space> [shape: s32[1], index: 0, kind: input, shape index: {}]   ;;  %s121_s1 = inlined_call_operand.vmem [shape: f32[16,128], index: 1, kind: input, shape index: {}]   ;;  %s122_s2 = inlined_call_operand.vmem [shape: f32[16,128], index: 2, kind: output, shape index: {}]  }
   0x1   :  { %s28_s11 = smul.u32 2654435769, %s120_s0  ;;  %v48_v24 = vstv %s120_s0  ;;  %v12_v51 = vld [vmem:[%s121_s1] sm:$0xff]  ;;  %v13_v54 = vld [vmem:[%s121_s1 + $0x8] sm:$0xff] }
   0x2   :  { %v16_v1 = vshrl.u32 %v15_v0, 7  ;;  %v19_v2 = vand.u32 127, %v15_v0 }
   0x3   :  { %v29_v5 = vstv %s28_s11 }
   0x4   :  { %v17_v3 = vadd.s32 8, %v16_v1  ;;  %v21_v4 = vmul.u32 128, %v16_v1 }
   0x6   :  { %v22_v6 = vmul.u32 128, %v17_v3  ;;  %v26_v7 = vadd.s32 %v21_v4, %v19_v2 }
   0x8   :  { %v27_v8 = vadd.s32 %v22_v6, %v19_v2  ;;  %v30_v9 = vadd.s32 %v29_v5, %v26_v7 }
   0xa   :  { %v31_v10 = vadd.s32 %v29_v5, %v27_v8  ;;  %v32_v11 = vshrl.u32 %v30_v9, 16 }
   0xc   :  { %v33_v12 = vshrl.u32 %v31_v10, 16  ;;  %v34_v13 = vxor.u32 %v32_v11, %v30_v9 }
   0xe   :  { %v35_v14 = vxor.u32 %v33_v12, %v31_v10  ;;  %v36_v15 = vmul.u32 2246822507, %v34_v13 }
  0x10   :  { %v37_v16 = vmul.u32 2246822507, %v35_v14  ;;  %v38_v17 = vshrl.u32 %v36_v15, 13 }
  0x12   :  { %v39_v18 = vshrl.u32 %v37_v16, 13  ;;  %v40_v19 = vxor.u32 %v38_v17, %v36_v15 }
  0x14   :  { %v41_v20 = vxor.u32 %v39_v18, %v37_v16  ;;  %v42_v21 = vmul.u32 3266489909, %v40_v19 }
  0x16   :  { %v43_v22 = vmul.u32 3266489909, %v41_v20  ;;  %v44_v23 = vshrl.u32 %v42_v21, 16 }
  0x18   :  { %v45_v25 = vshrl.u32 %v43_v22, 16  ;;  %v46_v26 = vxor.u32 %v44_v23, %v42_v21 }
  0x1a   :  { %v47_v27 = vxor.u32 %v45_v25, %v43_v22  ;;  %v49_v28 = vadd.s32 %v48_v24, %v46_v26 }
  0x1c   :  { %v50_v29 = vadd.s32 %v48_v24, %v47_v27  ;;  %v51_v30 = vshrl.u32 %v49_v28, 16 }
  0x1e   :  { %v53_v31 = vxor.u32 %v51_v30, %v49_v28  ;;  %v52_v32 = vshrl.u32 %v50_v29, 16 }
  0x20   :  { %v55_v33 = vmul.u32 2246822507, %v53_v31  ;;  %v54_v34 = vxor.u32 %v52_v32, %v50_v29 }
  0x22   :  { %v57_v35 = vshrl.u32 %v55_v33, 13  ;;  %v56_v36 = vmul.u32 2246822507, %v54_v34 }
  0x24   :  { %v59_v37 = vxor.u32 %v57_v35, %v55_v33  ;;  %v58_v38 = vshrl.u32 %v56_v36, 13 }
  0x26   :  { %v61_v39 = vmul.u32 3266489909, %v59_v37  ;;  %v60_v40 = vxor.u32 %v58_v38, %v56_v36 }
  0x28   :  { %v63_v41 = vshrl.u32 %v61_v39, 16  ;;  %v62_v42 = vmul.u32 3266489909, %v60_v40 }
  0x2a   :  { %v65_v43 = vxor.u32 %v63_v41, %v61_v39  ;;  %v64_v44 = vshrl.u32 %v62_v42, 16 }
  0x2c   :  { %v67_v45 = vadd.s32 %v65_v43, %v48_v24  ;;  %v66_v46 = vxor.u32 %v64_v44, %v62_v42 }
  0x2e   :  { %v69_v47 = vand.u32 8388607, %v67_v45  ;;  %v68_v48 = vadd.s32 %v66_v46, %v48_v24 }
  0x30   :  { %v71_v49 = vor.u32 1065353216, %v69_v47  ;;  %v70_v50 = vand.u32 8388607, %v68_v48 }
  0x32   :  { %v85_v52 = vadd.f32 -1.5, %v71_v49  ;;  %v72_v53 = vor.u32 1065353216, %v70_v50 }
  0x34   :  { %v77_v55 = vadd.f32 %v85_v52, %v12_v51  ;;  %v86_v56 = vadd.f32 -1.5, %v72_v53 }
  0x36   :  { %79 = vst [vmem:[%s122_s2] sm:$0xff] %v77_v55  ;;  %v78_v57 = vadd.f32 %v86_v56, %v13_v54 }
  0x38   :  { %80 = vst [vmem:[%s122_s2 + $0x8] sm:$0xff] %v78_v57 }

</bundles_post_ra>
